<compile_context>
chip_gen: v7x
topology: tpu7x:2x2x1
jax: 0.10.0
libtpu: 0.0.40
codegen_flags: <defaults>
</compile_context>

<pallas_src>
import functools

import numpy as np
import jax
import jax.numpy as jnp
from jax import lax
from jax.experimental import pallas as pl
from jax.experimental.pallas import tpu as pltpu


def _round_up(a, m):
    return -(-a // m) * m


def _deform_conv1d_kernel(xpad_ref, off_ref, wall_ref, out_ref, *,
                          ks, padding, stride, wt, wpad_true, tb, gather_dtype):
    """One (batch-block, width-tile) per program.

    xpad_ref: (tb, inc, kg)     zero-padded input, true padded width rounded to x8
    off_ref : (tb, ks, wt)      offset-conv output tile (bias already included)
    wall_ref: (ks*outc, inc)    main-conv weight, taps folded into the rows
    out_ref : (tb, outc, wt)    lane-dense output tile
    """
    kg = xpad_ref.shape[2]
    wall = wall_ref[...]                                   # (ks*outc, inc) f32
    outc = wall.shape[0] // ks

    wi = pl.program_id(1)
    w_start = (wi * wt).astype(jnp.float32)                # element offset of tile

    # Batch/tap-invariant temporaries (hoisted; JAX does not CSE broadcasts).
    rows = lax.broadcasted_iota(jnp.int32, (kg, 1), 0)                      # (kg, 1)
    col = lax.broadcasted_iota(jnp.int32, (1, wt), 1).astype(jnp.float32)   # (1, wt)
    p0 = (col + w_start) * float(stride) + 1.0                              # (1, wt)

    # Mask/clip constants from the TRUE padded width (ref: x.size(2) = W + 2*pad).
    qmax = float(wpad_true - 1)
    mask_lo = float(padding)
    mask_hi = float(wpad_true - 1 - padding)

    def body(b, carry):
        xb = xpad_ref[b]                                                    # (inc, kg)
        off = off_ref[b]                                                    # (ks, wt)
        # Fold w_conv into the gather LHS: one (ks*outc, inc) x (inc, kg) matmul,
        # then each tap only needs a single gather matmul.
        y = jnp.dot(wall, xb, preferred_element_type=jnp.float32)           # (ks*outc, kg)
        y = y.astype(gather_dtype)

        acc = jnp.zeros((outc, wt), jnp.float32)
        for n in range(ks):                               # static deformable taps
            pn = float(n - (ks - 1) // 2)
            p = p0 + pn + off[n:n + 1, :]                                   # (1, wt)
            floor_p = jnp.floor(p)
            q_lt = jnp.clip(floor_p, 0.0, qmax)
            q_rb = jnp.clip(floor_p + 1.0, 0.0, qmax)
            mask = jnp.logical_or(p < mask_lo, p > mask_hi).astype(jnp.float32)
            pm = jnp.clip(p * (1.0 - mask) + floor_p * mask, 0.0, qmax)
            # g_lt == g_rb in the reference: blend collapses to g*(x[q_lt]+x[q_rb]),
            # double-counting when q_lt == q_rb after clipping (as in the ref).
            g = (1.0 + (q_lt - pm)) * (1.0 - (q_rb - pm))                   # (1, wt)
            # 0/1/2-valued sampling matrix (exact in bf16); ONE gather matmul/tap.
            s = ((rows == q_lt.astype(jnp.int32)).astype(jnp.float32)
                 + (rows == q_rb.astype(jnp.int32)).astype(jnp.float32)
                 ).astype(gather_dtype)                                     # (kg, wt)
            yn = y[n * outc:(n + 1) * outc]                                 # (outc, kg)
            acc = acc + g * jnp.dot(yn, s, preferred_element_type=jnp.float32)
        out_ref[b] = acc.astype(out_ref.dtype)
        return carry

    lax.fori_loop(0, tb, body, 0)


def deform_conv1d(x, w_off, b_off, w_conv, *, kernel_size=3, padding=1, stride=1,
                  gather_dtype=jnp.bfloat16):
    """x: (B, inc, W); w_off: (ks, inc, 3); b_off: (ks,); w_conv: (outc, inc, ks)."""
    assert kernel_size == 3 and padding == 1 and stride == 1, \
        "kernel supports the module defaults (ks=3, padding=1, stride=1)"
    B, inc, W = x.shape
    ks = kernel_size
    outc = w_conv.shape[0]

    # ---- tiling / VMEM sizing -------------------------------------------------
    LANE = 128
    wpad_true = W + 2 * padding                 # reference padded width (mask/clip)
    kg = _round_up(wpad_true, 8)                # gather K (sublane-aligned)
    tb = min(B, 8)

    def vmem_est(wt_, tb_):
        io = (2 * tb_ * inc * kg                # x_pad (double-buffered)
              + 2 * tb_ * ks * wt_              # offsets
              + 2 * tb_ * outc * wt_            # output
              + 2 * ks * outc * inc) * 4
        temps = (2 * ks * outc * kg             # Y (f32 + gather-dtype copy)
                 + 6 * kg * wt_                 # one-hot / compare temporaries
                 + 2 * outc * wt_) * 4
        return io + temps

    try:
        vmem_cap = int(pltpu.get_tpu_info().vmem_capacity_bytes)
    except Exception:                           # interpret mode / unknown chip
        vmem_cap = 64 * 1024 * 1024             # conservative (v7x per-core)
    budget = int(0.6 * vmem_cap)

    w_ceiling = _round_up(W, LANE)
    wt = LANE
    while wt < 1024 and 2 * wt <= w_ceiling and vmem_est(2 * wt, tb) <= budget:
        wt *= 2
    while tb > 1 and vmem_est(wt, tb) > budget:
        tb //= 2
    # TODO(synk): for very long sequences the O(W) gather window per tile still
    # dominates MXU/VMEM; band-limit it (K = wt + 2R) once a runtime bound R on
    # |offset| is available via scalar prefetch.

    wp = _round_up(W, wt)
    bp = _round_up(B, tb)

    # ---- wrapper-side glue ------------------------------------------------------
    x_f = x.astype(jnp.float32)

    # offset = Conv1d(inc -> ks, kernel=3, pad=1, stride=1) + bias, as plain XLA.
    x_p1 = jnp.pad(x_f, ((0, 0), (0, 0), (1, 1)))
    taps = jnp.stack([x_p1[:, :, k:k + W] for k in range(3)], axis=-1)    # (B,inc,W,3)
    off = jnp.einsum('nck,bctk->bnt', w_off.astype(jnp.float32), taps) \
        + b_off.astype(jnp.float32)[None, :, None]                        # (B, ks, W)
    off_p = jnp.pad(off, ((0, bp - B), (0, 0), (0, wp - W)))

    # Zero-padded input: [padding zeros | x | zeros up to kg].  q is clipped to
    # wpad_true-1 <= kg-1, and positions W+padding..kg-1 are zero exactly like the
    # reference's right zero-pad, so the gather matches the reference values.
    x_pad = jnp.pad(x_f, ((0, bp - B), (0, 0), (padding, kg - padding - W)))

    # main-conv weight with taps folded into the LHS rows: row n*outc+o = w_conv[o,:,n]
    w_all = jnp.transpose(w_conv.astype(jnp.float32), (2, 0, 1)).reshape(ks * outc, inc)

    kernel = functools.partial(
        _deform_conv1d_kernel, ks=ks, padding=padding, stride=stride,
        wt=wt, wpad_true=wpad_true, tb=tb, gather_dtype=gather_dtype)

    vmem_limit = int(min(max(2 * vmem_est(wt, tb), 32 * 1024 * 1024),
                         int(0.85 * vmem_cap)))

    grid = (bp // tb, wp // wt)
    out = pl.pallas_call(
        kernel,
        out_shape=jax.ShapeDtypeStruct((bp, outc, wp), jnp.float32),
        grid=grid,
        in_specs=[
            # width-invariant block index => only re-DMA'd when the batch block changes
            pl.BlockSpec((tb, inc, kg), lambda b, w: (b, 0, 0)),
            pl.BlockSpec((tb, ks, wt), lambda b, w: (b, 0, w)),
            pl.BlockSpec((ks * outc, inc), lambda b, w: (0, 0)),
        ],
        out_specs=pl.BlockSpec((tb, outc, wt), lambda b, w: (b, 0, w)),
        compiler_params=pltpu.CompilerParams(
            dimension_semantics=("parallel", "parallel"),
            vmem_limit_bytes=vmem_limit),
    )(x_pad, off_p, w_all)
    return out[:B, :, :W]


def deform_conv1d_ref(x, w_off, b_off, w_conv, *, kernel_size=3, padding=1, stride=1):
    """Pure-JAX mirror of the PyTorch forward (with the intended-semantics fixes)."""
    B, inc, W = x.shape
    ks = kernel_size
    # offset conv (k=3, pad=1, stride=1)
    x_p1 = jnp.pad(x, ((0, 0), (0, 0), (1, 1)))
    taps = jnp.stack([x_p1[:, :, k:k + W] for k in range(3)], axis=-1)     # (B,C,W,3)
    offset = jnp.einsum('nck,bctk->bnt', w_off, taps) + b_off[None, :, None]
    h = offset.shape[2]
    x_pad = jnp.pad(x, ((0, 0), (0, 0), (padding, padding)))
    wpad = x_pad.shape[2]
    p_n = jnp.arange(-(ks - 1) // 2, (ks - 1) // 2 + 1, dtype=jnp.float32).reshape(1, ks, 1)
    p_0 = jnp.arange(1, h * stride + 1, stride, dtype=jnp.float32).reshape(1, 1, h)
    p = jnp.transpose(p_0 + p_n + offset, (0, 2, 1))                        # (B,h,ks)
    floor_p = jnp.floor(p)
    q_lt = jnp.clip(floor_p, 0, wpad - 1)
    q_rb = jnp.clip(floor_p + 1, 0, wpad - 1)
    mask = jnp.logical_or(p < padding, p > wpad - 1 - padding).astype(p.dtype)
    p2 = jnp.clip(p * (1 - mask) + floor_p * mask, 0, wpad - 1)
    g_lt = (1 + (q_lt - p2)) * (1 - (q_rb - p2))
    g_rb = (1 - (q_rb - p2)) * (1 + (q_lt - p2))
    bi = jnp.arange(B)[:, None, None, None]
    ci = jnp.arange(inc)[None, :, None, None]
    x_q_lt = x_pad[bi, ci, q_lt.astype(jnp.int32)[:, None, :, :]]
    x_q_rb = x_pad[bi, ci, q_rb.astype(jnp.int32)[:, None, :, :]]
    x_off = g_lt[:, None] * x_q_lt + g_rb[:, None] * x_q_rb                 # (B,C,h,ks)
    return jnp.einsum('ocn,bctn->bot', w_conv, x_off)


if __name__ == "__main__":
    B, inc, outc, W, ks = 2, 4, 8, 16, 3
    key = jax.random.PRNGKey(0)
    k1, k2, k3, k4 = jax.random.split(key, 4)

    x = jax.random.normal(k1, (B, inc, W), jnp.float32)
    # PyTorch __init__ zeros offset_conv.weight; small random values are used here
    # so the data-dependent sampling path is actually exercised (same forward math).
    w_off = 0.1 * jax.random.normal(k2, (ks, inc, 3), jnp.float32)
    bound = 1.0 / (inc * 3) ** 0.5
    b_off = jax.random.uniform(k3, (ks,), jnp.float32, -bound, bound)
    w_conv = jax.random.normal(k4, (outc, inc, ks), jnp.float32) / (inc * ks) ** 0.5

    ref = deform_conv1d_ref(x, w_off, b_off, w_conv)

    # Exact path (f32 gather matmul): must match the reference tightly.
    out_f32 = jax.block_until_ready(
        deform_conv1d(x, w_off, b_off, w_conv, gather_dtype=jnp.float32))
    assert out_f32.shape == (B, outc, W)
    np.testing.assert_allclose(np.asarray(out_f32), np.asarray(ref), rtol=1e-4, atol=1e-4)

    # Default fast path (bf16 gather operands; sampling matrix exact, Y rounded).
    out_bf16 = jax.block_until_ready(deform_conv1d(x, w_off, b_off, w_conv))
    np.testing.assert_allclose(np.asarray(out_bf16), np.asarray(ref), rtol=2e-2, atol=2e-2)

    print("KERNEL_OK")
</pallas_src>

<mosaic_0001>
module attributes {stable_mosaic.version = 11 : i64} {
  func.func @_deform_conv1d_kernel(%arg0: i32, %arg1: i32, %arg2: memref<2x4x24xf32, #tpu.memory_space<vmem>>, %arg3: memref<2x3x128xf32, #tpu.memory_space<vmem>>, %arg4: memref<24x4xf32, #tpu.memory_space<vmem>>, %arg5: memref<2x8x128xf32, #tpu.memory_space<vmem>>) attributes {dimension_semantics = [#tpu.dimension_semantics<parallel>, #tpu.dimension_semantics<parallel>], iteration_bounds = array<i64: 1, 1>, scalar_prefetch = 0 : i64, scratch_operands = 0 : i64, tpu.core_type = #tpu.core_type<tc>, window_params = [{transform_indices = @transform_0, window_bounds = array<i64: 2, 4, 24>}, {transform_indices = @transform_1, window_bounds = array<i64: 2, 3, 128>}, {pipeline_mode = #tpu.pipeline_mode<synchronous>, transform_indices = @transform_2, window_bounds = array<i64: 24, 4>}, {transform_indices = @transform_3, window_bounds = array<i64: 2, 8, 128>}]} {
    %c0 = arith.constant 0 : index
    %c0_0 = arith.constant 0 : index
    %0 = vector.load %arg4[%c0, %c0_0] : memref<24x4xf32, #tpu.memory_space<vmem>>, vector<24x4xf32>
    %c128_i32 = arith.constant 128 : i32
    %1 = arith.muli %arg1, %c128_i32 : i32
    %2 = arith.sitofp %1 : i32 to f32
    %3 = tpu.iota {dimensions = array<i32: 0>} : vector<24x1xi32>
    %4 = tpu.iota {dimensions = array<i32: 1>} : vector<1x128xi32>
    %5 = arith.sitofp %4 : vector<1x128xi32> to vector<1x128xf32>
    %6 = vector.broadcast %2 : f32 to vector<1x128xf32>
    %7 = arith.addf %5, %6 : vector<1x128xf32>
    %cst = arith.constant 1.000000e+00 : f32
    %8 = vector.broadcast %cst : f32 to vector<1x128xf32>
    %9 = arith.mulf %7, %8 : vector<1x128xf32>
    %cst_1 = arith.constant 1.000000e+00 : f32
    %10 = vector.broadcast %cst_1 : f32 to vector<1x128xf32>
    %11 = arith.addf %9, %10 : vector<1x128xf32>
    %c0_i32 = arith.constant 0 : i32
    %c2_i32 = arith.constant 2 : i32
    %12 = arith.addi %c0_i32, %c2_i32 : i32
    %c1_i32 = arith.constant 1 : i32
    scf.for %arg6 = %c0_i32 to %12 step %c1_i32  : i32 {
      %13 = arith.index_cast %arg6 : i32 to index
      %c0_3 = arith.constant 0 : index
      %c0_4 = arith.constant 0 : index
      %14 = vector.load %arg2[%13, %c0_3, %c0_4] : memref<2x4x24xf32, #tpu.memory_space<vmem>>, vector<1x4x24xf32>
      %15 = vector.shape_cast %14 : vector<1x4x24xf32> to vector<4x24xf32>
      %16 = arith.index_cast %arg6 : i32 to index
      %c0_5 = arith.constant 0 : index
      %c0_6 = arith.constant 0 : index
      %17 = vector.load %arg3[%16, %c0_5, %c0_6] : memref<2x3x128xf32, #tpu.memory_space<vmem>>, vector<1x3x128xf32>
      %18 = vector.shape_cast %17 : vector<1x3x128xf32> to vector<3x128xf32>
      %cst_7 = arith.constant dense<0.000000e+00> : vector<24x24xf32>
      %19 = tpu.matmul %0, %15, %cst_7 {dimension_numbers = #tpu.dot_dimension_numbers<[1], [0], [0], [1], [0, 0, 1, 1], [], []>} : vector<24x4xf32>, vector<4x24xf32>, vector<24x24xf32> -> vector<24x24xf32>
      %cst_8 = arith.constant 0.000000e+00 : f32
      %20 = vector.broadcast %cst_8 : f32 to vector<8x128xf32>
      %cst_9 = arith.constant -1.000000e+00 : f32
      %21 = vector.broadcast %cst_9 : f32 to vector<1x128xf32>
      %22 = arith.addf %11, %21 : vector<1x128xf32>
      %23 = vector.extract_strided_slice %18 {offsets = [0, 0], sizes = [1, 128], strides = [1, 1]} : vector<3x128xf32> to vector<1x128xf32>
      %24 = arith.addf %22, %23 : vector<1x128xf32>
      %25 = math.floor %24 : vector<1x128xf32>
      %cst_10 = arith.constant 0.000000e+00 : f32
      %cst_11 = arith.constant 1.700000e+01 : f32
      %26 = vector.broadcast %cst_10 : f32 to vector<1x128xf32>
      %27 = arith.maximumf %26, %25 : vector<1x128xf32>
      %28 = vector.broadcast %cst_11 : f32 to vector<1x128xf32>
      %29 = arith.minimumf %28, %27 : vector<1x128xf32>
      %cst_12 = arith.constant 1.000000e+00 : f32
      %30 = vector.broadcast %cst_12 : f32 to vector<1x128xf32>
      %31 = arith.addf %25, %30 : vector<1x128xf32>
      %cst_13 = arith.constant 0.000000e+00 : f32
      %cst_14 = arith.constant 1.700000e+01 : f32
      %32 = vector.broadcast %cst_13 : f32 to vector<1x128xf32>
      %33 = arith.maximumf %32, %31 : vector<1x128xf32>
      %34 = vector.broadcast %cst_14 : f32 to vector<1x128xf32>
      %35 = arith.minimumf %34, %33 : vector<1x128xf32>
      %cst_15 = arith.constant 1.000000e+00 : f32
      %36 = vector.broadcast %cst_15 : f32 to vector<1x128xf32>
      %37 = arith.cmpf olt, %24, %36 : vector<1x128xf32>
      %cst_16 = arith.constant 1.600000e+01 : f32
      %38 = vector.broadcast %cst_16 : f32 to vector<1x128xf32>
      %39 = arith.cmpf ogt, %24, %38 : vector<1x128xf32>
      %40 = arith.ori %37, %39 : vector<1x128xi1>
      %41 = arith.extui %40 : vector<1x128xi1> to vector<1x128xi32>
      %42 = arith.sitofp %41 : vector<1x128xi32> to vector<1x128xf32>
      %cst_17 = arith.constant 1.000000e+00 : f32
      %43 = vector.broadcast %cst_17 : f32 to vector<1x128xf32>
      %44 = arith.subf %43, %42 : vector<1x128xf32>
      %45 = arith.mulf %24, %44 : vector<1x128xf32>
      %46 = arith.mulf %25, %42 : vector<1x128xf32>
      %47 = arith.addf %45, %46 : vector<1x128xf32>
      %cst_18 = arith.constant 0.000000e+00 : f32
      %cst_19 = arith.constant 1.700000e+01 : f32
      %48 = vector.broadcast %cst_18 : f32 to vector<1x128xf32>
      %49 = arith.maximumf %48, %47 : vector<1x128xf32>
      %50 = vector.broadcast %cst_19 : f32 to vector<1x128xf32>
      %51 = arith.minimumf %50, %49 : vector<1x128xf32>
      %52 = arith.subf %29, %51 : vector<1x128xf32>
      %cst_20 = arith.constant 1.000000e+00 : f32
      %53 = vector.broadcast %cst_20 : f32 to vector<1x128xf32>
      %54 = arith.addf %53, %52 : vector<1x128xf32>
      %55 = arith.subf %35, %51 : vector<1x128xf32>
      %cst_21 = arith.constant 1.000000e+00 : f32
      %56 = vector.broadcast %cst_21 : f32 to vector<1x128xf32>
      %57 = arith.subf %56, %55 : vector<1x128xf32>
      %58 = arith.mulf %54, %57 : vector<1x128xf32>
      %59 = arith.fptosi %29 : vector<1x128xf32> to vector<1x128xi32>
      %60 = vector.broadcast %3 : vector<24x1xi32> to vector<24x128xi32>
      %61 = vector.broadcast %59 : vector<1x128xi32> to vector<24x128xi32>
      %62 = arith.cmpi eq, %60, %61 : vector<24x128xi32>
      %63 = arith.extui %62 : vector<24x128xi1> to vector<24x128xi32>
      %64 = arith.sitofp %63 : vector<24x128xi32> to vector<24x128xf32>
      %65 = arith.fptosi %35 : vector<1x128xf32> to vector<1x128xi32>
      %66 = vector.broadcast %3 : vector<24x1xi32> to vector<24x128xi32>
      %67 = vector.broadcast %65 : vector<1x128xi32> to vector<24x128xi32>
      %68 = arith.cmpi eq, %66, %67 : vector<24x128xi32>
      %69 = arith.extui %68 : vector<24x128xi1> to vector<24x128xi32>
      %70 = arith.sitofp %69 : vector<24x128xi32> to vector<24x128xf32>
      %71 = arith.addf %64, %70 : vector<24x128xf32>
      %72 = vector.extract_strided_slice %19 {offsets = [0, 0], sizes = [8, 24], strides = [1, 1]} : vector<24x24xf32> to vector<8x24xf32>
      %cst_22 = arith.constant dense<0.000000e+00> : vector<8x128xf32>
      %73 = tpu.matmul %72, %71, %cst_22 {dimension_numbers = #tpu.dot_dimension_numbers<[1], [0], [0], [1], [0, 0, 1, 1], [], []>} : vector<8x24xf32>, vector<24x128xf32>, vector<8x128xf32> -> vector<8x128xf32>
      %74 = vector.broadcast %58 : vector<1x128xf32> to vector<8x128xf32>
      %75 = arith.mulf %74, %73 : vector<8x128xf32>
      %76 = arith.addf %20, %75 : vector<8x128xf32>
      %cst_23 = arith.constant 0.000000e+00 : f32
      %77 = vector.broadcast %cst_23 : f32 to vector<1x128xf32>
      %78 = arith.addf %11, %77 : vector<1x128xf32>
      %79 = vector.extract_strided_slice %18 {offsets = [1, 0], sizes = [1, 128], strides = [1, 1]} : vector<3x128xf32> to vector<1x128xf32>
      %80 = arith.addf %78, %79 : vector<1x128xf32>
      %81 = math.floor %80 : vector<1x128xf32>
      %cst_24 = arith.constant 0.000000e+00 : f32
      %cst_25 = arith.constant 1.700000e+01 : f32
      %82 = vector.broadcast %cst_24 : f32 to vector<1x128xf32>
      %83 = arith.maximumf %82, %81 : vector<1x128xf32>
      %84 = vector.broadcast %cst_25 : f32 to vector<1x128xf32>
      %85 = arith.minimumf %84, %83 : vector<1x128xf32>
      %cst_26 = arith.constant 1.000000e+00 : f32
      %86 = vector.broadcast %cst_26 : f32 to vector<1x128xf32>
      %87 = arith.addf %81, %86 : vector<1x128xf32>
      %cst_27 = arith.constant 0.000000e+00 : f32
      %cst_28 = arith.constant 1.700000e+01 : f32
      %88 = vector.broadcast %cst_27 : f32 to vector<1x128xf32>
      %89 = arith.maximumf %88, %87 : vector<1x128xf32>
      %90 = vector.broadcast %cst_28 : f32 to vector<1x128xf32>
      %91 = arith.minimumf %90, %89 : vector<1x128xf32>
      %cst_29 = arith.constant 1.000000e+00 : f32
      %92 = vector.broadcast %cst_29 : f32 to vector<1x128xf32>
      %93 = arith.cmpf olt, %80, %92 : vector<1x128xf32>
      %cst_30 = arith.constant 1.600000e+01 : f32
      %94 = vector.broadcast %cst_30 : f32 to vector<1x128xf32>
      %95 = arith.cmpf ogt, %80, %94 : vector<1x128xf32>
      %96 = arith.ori %93, %95 : vector<1x128xi1>
      %97 = arith.extui %96 : vector<1x128xi1> to vector<1x128xi32>
      %98 = arith.sitofp %97 : vector<1x128xi32> to vector<1x128xf32>
      %cst_31 = arith.constant 1.000000e+00 : f32
      %99 = vector.broadcast %cst_31 : f32 to vector<1x128xf32>
      %100 = arith.subf %99, %98 : vector<1x128xf32>
      %101 = arith.mulf %80, %100 : vector<1x128xf32>
      %102 = arith.mulf %81, %98 : vector<1x128xf32>
      %103 = arith.addf %101, %102 : vector<1x128xf32>
      %cst_32 = arith.constant 0.000000e+00 : f32
      %cst_33 = arith.constant 1.700000e+01 : f32
      %104 = vector.broadcast %cst_32 : f32 to vector<1x128xf32>
      %105 = arith.maximumf %104, %103 : vector<1x128xf32>
      %106 = vector.broadcast %cst_33 : f32 to vector<1x128xf32>
      %107 = arith.minimumf %106, %105 : vector<1x128xf32>
      %108 = arith.subf %85, %107 : vector<1x128xf32>
      %cst_34 = arith.constant 1.000000e+00 : f32
      %109 = vector.broadcast %cst_34 : f32 to vector<1x128xf32>
      %110 = arith.addf %109, %108 : vector<1x128xf32>
      %111 = arith.subf %91, %107 : vector<1x128xf32>
      %cst_35 = arith.constant 1.000000e+00 : f32
      %112 = vector.broadcast %cst_35 : f32 to vector<1x128xf32>
      %113 = arith.subf %112, %111 : vector<1x128xf32>
      %114 = arith.mulf %110, %113 : vector<1x128xf32>
      %115 = arith.fptosi %85 : vector<1x128xf32> to vector<1x128xi32>
      %116 = vector.broadcast %3 : vector<24x1xi32> to vector<24x128xi32>
      %117 = vector.broadcast %115 : vector<1x128xi32> to vector<24x128xi32>
      %118 = arith.cmpi eq, %116, %117 : vector<24x128xi32>
      %119 = arith.extui %118 : vector<24x128xi1> to vector<24x128xi32>
      %120 = arith.sitofp %119 : vector<24x128xi32> to vector<24x128xf32>
      %121 = arith.fptosi %91 : vector<1x128xf32> to vector<1x128xi32>
      %122 = vector.broadcast %3 : vector<24x1xi32> to vector<24x128xi32>
      %123 = vector.broadcast %121 : vector<1x128xi32> to vector<24x128xi32>
      %124 = arith.cmpi eq, %122, %123 : vector<24x128xi32>
      %125 = arith.extui %124 : vector<24x128xi1> to vector<24x128xi32>
      %126 = arith.sitofp %125 : vector<24x128xi32> to vector<24x128xf32>
      %127 = arith.addf %120, %126 : vector<24x128xf32>
      %128 = vector.extract_strided_slice %19 {offsets = [8, 0], sizes = [8, 24], strides = [1, 1]} : vector<24x24xf32> to vector<8x24xf32>
      %cst_36 = arith.constant dense<0.000000e+00> : vector<8x128xf32>
      %129 = tpu.matmul %128, %127, %cst_36 {dimension_numbers = #tpu.dot_dimension_numbers<[1], [0], [0], [1], [0, 0, 1, 1], [], []>} : vector<8x24xf32>, vector<24x128xf32>, vector<8x128xf32> -> vector<8x128xf32>
      %130 = vector.broadcast %114 : vector<1x128xf32> to vector<8x128xf32>
      %131 = arith.mulf %130, %129 : vector<8x128xf32>
      %132 = arith.addf %76, %131 : vector<8x128xf32>
      %cst_37 = arith.constant 1.000000e+00 : f32
      %133 = vector.broadcast %cst_37 : f32 to vector<1x128xf32>
      %134 = arith.addf %11, %133 : vector<1x128xf32>
      %135 = vector.extract_strided_slice %18 {offsets = [2, 0], sizes = [1, 128], strides = [1, 1]} : vector<3x128xf32> to vector<1x128xf32>
      %136 = arith.addf %134, %135 : vector<1x128xf32>
      %137 = math.floor %136 : vector<1x128xf32>
      %cst_38 = arith.constant 0.000000e+00 : f32
      %cst_39 = arith.constant 1.700000e+01 : f32
      %138 = vector.broadcast %cst_38 : f32 to vector<1x128xf32>
      %139 = arith.maximumf %138, %137 : vector<1x128xf32>
      %140 = vector.broadcast %cst_39 : f32 to vector<1x128xf32>
      %141 = arith.minimumf %140, %139 : vector<1x128xf32>
      %cst_40 = arith.constant 1.000000e+00 : f32
      %142 = vector.broadcast %cst_40 : f32 to vector<1x128xf32>
      %143 = arith.addf %137, %142 : vector<1x128xf32>
      %cst_41 = arith.constant 0.000000e+00 : f32
      %cst_42 = arith.constant 1.700000e+01 : f32
      %144 = vector.broadcast %cst_41 : f32 to vector<1x128xf32>
      %145 = arith.maximumf %144, %143 : vector<1x128xf32>
      %146 = vector.broadcast %cst_42 : f32 to vector<1x128xf32>
      %147 = arith.minimumf %146, %145 : vector<1x128xf32>
      %cst_43 = arith.constant 1.000000e+00 : f32
      %148 = vector.broadcast %cst_43 : f32 to vector<1x128xf32>
      %149 = arith.cmpf olt, %136, %148 : vector<1x128xf32>
      %cst_44 = arith.constant 1.600000e+01 : f32
      %150 = vector.broadcast %cst_44 : f32 to vector<1x128xf32>
      %151 = arith.cmpf ogt, %136, %150 : vector<1x128xf32>
      %152 = arith.ori %149, %151 : vector<1x128xi1>
      %153 = arith.extui %152 : vector<1x128xi1> to vector<1x128xi32>
      %154 = arith.sitofp %153 : vector<1x128xi32> to vector<1x128xf32>
      %cst_45 = arith.constant 1.000000e+00 : f32
      %155 = vector.broadcast %cst_45 : f32 to vector<1x128xf32>
      %156 = arith.subf %155, %154 : vector<1x128xf32>
      %157 = arith.mulf %136, %156 : vector<1x128xf32>
      %158 = arith.mulf %137, %154 : vector<1x128xf32>
      %159 = arith.addf %157, %158 : vector<1x128xf32>
      %cst_46 = arith.constant 0.000000e+00 : f32
      %cst_47 = arith.constant 1.700000e+01 : f32
      %160 = vector.broadcast %cst_46 : f32 to vector<1x128xf32>
      %161 = arith.maximumf %160, %159 : vector<1x128xf32>
      %162 = vector.broadcast %cst_47 : f32 to vector<1x128xf32>
      %163 = arith.minimumf %162, %161 : vector<1x128xf32>
      %164 = arith.subf %141, %163 : vector<1x128xf32>
      %cst_48 = arith.constant 1.000000e+00 : f32
      %165 = vector.broadcast %cst_48 : f32 to vector<1x128xf32>
      %166 = arith.addf %165, %164 : vector<1x128xf32>
      %167 = arith.subf %147, %163 : vector<1x128xf32>
      %cst_49 = arith.constant 1.000000e+00 : f32
      %168 = vector.broadcast %cst_49 : f32 to vector<1x128xf32>
      %169 = arith.subf %168, %167 : vector<1x128xf32>
      %170 = arith.mulf %166, %169 : vector<1x128xf32>
      %171 = arith.fptosi %141 : vector<1x128xf32> to vector<1x128xi32>
      %172 = vector.broadcast %3 : vector<24x1xi32> to vector<24x128xi32>
      %173 = vector.broadcast %171 : vector<1x128xi32> to vector<24x128xi32>
      %174 = arith.cmpi eq, %172, %173 : vector<24x128xi32>
      %175 = arith.extui %174 : vector<24x128xi1> to vector<24x128xi32>
      %176 = arith.sitofp %175 : vector<24x128xi32> to vector<24x128xf32>
      %177 = arith.fptosi %147 : vector<1x128xf32> to vector<1x128xi32>
      %178 = vector.broadcast %3 : vector<24x1xi32> to vector<24x128xi32>
      %179 = vector.broadcast %177 : vector<1x128xi32> to vector<24x128xi32>
      %180 = arith.cmpi eq, %178, %179 : vector<24x128xi32>
      %181 = arith.extui %180 : vector<24x128xi1> to vector<24x128xi32>
      %182 = arith.sitofp %181 : vector<24x128xi32> to vector<24x128xf32>
      %183 = arith.addf %176, %182 : vector<24x128xf32>
      %184 = vector.extract_strided_slice %19 {offsets = [16, 0], sizes = [8, 24], strides = [1, 1]} : vector<24x24xf32> to vector<8x24xf32>
      %cst_50 = arith.constant dense<0.000000e+00> : vector<8x128xf32>
      %185 = tpu.matmul %184, %183, %cst_50 {dimension_numbers = #tpu.dot_dimension_numbers<[1], [0], [0], [1], [0, 0, 1, 1], [], []>} : vector<8x24xf32>, vector<24x128xf32>, vector<8x128xf32> -> vector<8x128xf32>
      %186 = vector.broadcast %170 : vector<1x128xf32> to vector<8x128xf32>
      %187 = arith.mulf %186, %185 : vector<8x128xf32>
      %188 = arith.addf %132, %187 : vector<8x128xf32>
      %189 = arith.index_cast %arg6 : i32 to index
      %c0_51 = arith.constant 0 : index
      %c0_52 = arith.constant 0 : index
      %190 = vector.load %arg5[%189, %c0_51, %c0_52] : memref<2x8x128xf32, #tpu.memory_space<vmem>>, vector<1x8x128xf32>
      %191 = vector.shape_cast %190 : vector<1x8x128xf32> to vector<8x128xf32>
      %192 = vector.shape_cast %188 : vector<8x128xf32> to vector<1x8x128xf32>
      tpu.vector_store %arg5[%189, %c0_51, %c0_52], %192 {strides = array<i32>} : memref<2x8x128xf32, #tpu.memory_space<vmem>>, vector<1x8x128xf32>,
    }
    %c2_i32_2 = arith.constant 2 : i32
    return
  }
  func.func @transform_0(%arg0: i32, %arg1: i32) -> (i32, i32, i32) {
    %c0_i32 = arith.constant 0 : i32
    %c0_i32_0 = arith.constant 0 : i32
    %c0_i32_1 = arith.constant 0 : i32
    return %arg0, %c0_i32, %c0_i32_0 : i32, i32, i32
  }
  func.func @transform_1(%arg0: i32, %arg1: i32) -> (i32, i32, i32) {
    %c0_i32 = arith.constant 0 : i32
    %c0_i32_0 = arith.constant 0 : i32
    return %arg0, %c0_i32, %arg1 : i32, i32, i32
  }
  func.func @transform_2(%arg0: i32, %arg1: i32) -> (i32, i32) {
    %c0_i32 = arith.constant 0 : i32
    %c0_i32_0 = arith.constant 0 : i32
    %c0_i32_1 = arith.constant 0 : i32
    return %c0_i32, %c0_i32_0 : i32, i32
  }
  func.func @transform_3(%arg0: i32, %arg1: i32) -> (i32, i32, i32) {
    %c0_i32 = arith.constant 0 : i32
    %c0_i32_0 = arith.constant 0 : i32
    return %arg0, %c0_i32, %arg1 : i32, i32, i32
  }
}

</mosaic_0001>

<bundles_post_ra>
// kernel: tpu_custom_call.1
= control target key start
LH: loop header
LB: loop body
LE: loop exit
PB: predicated region body
PF: predicated region fallthrough
CT: control target
= control target key end

     0   :  { %8 = vsyncpa [#allocation3], 0  ;;  %v20_v2 = vlaneseq  ;;  %s770_s18 = smov 0   ;;  %s939_s0 = inlined_call_operand.vmem [shape: f32[2,4,24], index: 0, kind: input, shape index: {}]   ;;  %s940_s1 = inlined_call_operand.vmem [shape: f32[2,3,128], index: 1, kind: input, shape index: {}]   ;;  %s941_s2 = inlined_call_operand.vmem [shape: f32[24,4], index: 2, kind: input, shape index: {}]   ;;  %s942_s3 = inlined_call_operand.hbm [shape: f32[2,8,128], index: 3, kind: output, shape index: {}]  }
   0x1   :  { %v748_v0 = vld [vmem:[%s941_s2] sm:$0xff]  ;;  %v753_v1 = vld [vmem:[%s941_s2 + $0x8] sm:$0xff]  ;;  %v758_v3 = vld [vmem:[%s941_s2 + $0x10] sm:$0xff] }
   0x2   :  { %v760_v4 = vshrl.u32 %v20_v2, 7  ;;  %v25_v5 = vand.u32 127, %v20_v2 }
   0x4   :  { %v763_v6 = vadd.s32 8, %v760_v4  ;;  %v766_v7 = vadd.s32 16, %v760_v4  ;;  %v26_v8 = vcvt.s32.f32 %v25_v5 }
   0x6   :  { %v768_v9 = vadd.f32 1.0, %v26_v8 }
   0x7 LB: > { %v719_v10 = vmov 0.0   ;;  %s568_s2 = sshll.u32 %s717_s18, 2  ;;  %vm51_vm0 = vcmask 1043456   ;;  %vm720_vm1 = vmmov 0   ;;  %v721_v13 = vmov 0.0|0.0   ;;  %s597_s25 = sshll.u32 %s717_s18, 3  ;;  %s717_s18 = sphi %s770_s18, %s35_s18  }
   0x8   : > { %614 = vmatprep.subr.mxu0 %v719_v10  ;;  %v135_v11 = vadd.f32 -1.0, %v768_v9  ;;  %v404_v12 = vadd.f32 1.0, %v768_v9  ;;  %616 = vmatprep.mubr.msk.f32.mxu0 %vm720_vm1, %v719_v10  ;;  %s37_s21 = scalar_lea.vmem %s939_s0, %s568_s2  ;;  %s39_s24 = scalar_lea.vmem %s940_s1, %s568_s2  ;;  %vm41_vm2 = vcmask 31744   ;;  %v823_v29 = vsub.s32 0, %v760_v4 }
   0x9   : > { %652 = vmatprep.subr.bf16.mxu1 %v721_v13  ;;  %631 = vmatprep.mubr.msk.f32.mxu1 %vm720_vm1, %v719_v10  ;;  %v38_v14 = vld [vmem:[%s37_s21] sm:$0xf]  ;;  %v833_v33 = vsub.s32 2, %v760_v4  ;;  %s539_s26 = scalar_lea.vmem [#allocation2], %s597_s25  ;;  %s35_s18 = sadd.s32 1, %s717_s18  }
   0xa   : > { %v790_v15 = vld [vmem:[%s39_s24] sm:$0x7]  ;;  %615 = vmatpush3.msk.msra.mxu0 %vm51_vm0, %v38_v14  ;;  %p32_p0 = scmp.ge.s32.totalorder %s35_s18, 2  }
   0xb   : > { %v793_v16 = vadd.f32 %v135_v11, %v790_v15  ;;  %v796_v17 = vadd.f32 %v404_v12, %v790_v15  ;;  %617 = vmatmul.mubr.msk.f32.vlgmr.msra.gmra.mrb[0].mxu0 %vm41_vm2, %v748_v0  ;;  %658 = vmatprep.subr.bf16.mxu0 %v721_v13  ;;  %v271_v2 = vadd.f32 %v790_v15, %v768_v9  ;;  %s722_s27 = smov (%p32_p0), [#allocation2]  }
   0xc   : > { %619 = vmatprep.mubr.msk.f32.mxu0 %vm720_vm1, %v719_v10  ;;  %s546_s28 = sshll.u32 (%p32_p0), %s722_s27, 4  ;;  %s547_s28 = int_to_ptr.vmem [resolvable:$true] %s546_s28 }
   0xd   : > { %v802_v18 = vfloor.f32 %v793_v16  ;;  %v807_v19 = vfloor.f32 %v796_v17  ;;  %v272_v5 = vfloor.f32 %v271_v2  ;;  %s687_s29 = scalar_lea.vmem (%p32_p0), %s547_s28, 256  ;;  %p692_p2 = scmp.lt.s32.totalorder (%p32_p0), %s547_s28, %s547_s28 }
   0xe   :  { %p688_p1 = scmp.ne.s32.totalorder (%p32_p0), %s547_s28, %s687_s29  ;;  %p693_p3 = scmp.lt.s32.totalorder (%p32_p0), %s687_s29, %s687_s29 }
   0xf   : > { %v138_v20 = vmax.f32 %v802_v18, 0.0  ;;  %v407_v21 = vmax.f32 %v807_v19, 0.0  ;;  %v409_v22 = vadd.f32 1.0, %v807_v19  ;;  %620 = vmatmul.mubr.msk.f32.gmra.mrb[2].mxu0 %vm41_vm2, %v753_v1  ;;  %v140_v23 = vadd.f32 1.0, %v802_v18 }
  0x10   : > { %622 = vmatprep.mubr.msk.f32.mxu0 %vm720_vm1, %v719_v10  ;;  %v275_v8 = vadd.f32 1.0, %v272_v5  ;;  %v273_v11 = vmax.f32 %v272_v5, 0.0  ;;  %p694_p4 = por (%p32_p0), %p693_p3, %p692_p2 }
  0x11   : > { %v817_v24 = vmin.f32 %v138_v20, 17.0  ;;  %v819_v25 = vmin.f32 %v407_v21, 17.0  ;;  %v410_v26 = vmax.f32 %v409_v22, 0.0  ;;  %v141_v27 = vmax.f32 %v140_v23, 0.0 }
  0x12   : > { %v276_v12 = vmax.f32 %v275_v8, 0.0  ;;  %v874_v14 = vmin.f32 %v273_v11, 17.0  ;;  %v881_v23 = vsub.s32 1, %v760_v4  ;;  %p695_p5 = pnand (%p32_p0), %p694_p4, %p688_p1 }
  0x13   : > { %v661_v28 = vtrunc.f32 %v817_v24  ;;  %v825_v30 = vmin.f32 %v410_v26, 17.0  ;;  %623 = vmatmul.mubr.msk.f32.gmra.mrb[4].mxu0 %vm41_vm2, %v758_v3  ;;  %v829_v31 = vmin.f32 %v141_v27, 17.0  ;;  %v669_v32 = vtrunc.f32 %v819_v25 }
  0x14   : > { %649 = vmatprep.mubr.msk.f32.mxu0 %vm720_vm1, %v719_v10  ;;  %v665_v20 = vtrunc.f32 %v874_v14 }
  0x15   : > { %v662_v34 = vcvt.f32.s32 %v661_v28  ;;  %v663_v35 = vtrunc.f32 %v829_v31  ;;  %v670_v36 = vcvt.f32.s32 %v669_v32  ;;  %v671_v37 = vtrunc.f32 %v825_v30 }
  0x16   : > { %v666_v22 = vcvt.f32.s32 %v665_v20 }
  0x17   : > { %v163_v38 = vrot.slane %v662_v34, %v823_v29  ;;  %v664_v39 = vcvt.f32.s32 %v663_v35  ;;  %v432_v40 = vrot.slane %v670_v36, %v833_v33  ;;  %v672_v41 = vcvt.f32.s32 %v671_v37 }
  0x18   : > { %v298_v27 = vrot.slane %v666_v22, %v881_v23 }
  0x19   : > { %vm164_vm3 = vcmp.eq.s32.totalorder %v760_v4, %v163_v38  ;;  %vm165_vm4 = vcmp.eq.s32.totalorder %v763_v6, %v163_v38  ;;  %v177_v43 = vrot.slane %v664_v39, %v823_v29  ;;  %vm433_vm5 = vcmp.eq.s32.totalorder %v760_v4, %v432_v40 }
  0x1a   : > { %v574_v42 = vsel %vm164_vm3, 1.0, %v719_v10  ;;  %vm166_vm6 = vcmp.eq.s32.totalorder %v766_v7, %v163_v38  ;;  %v575_v44 = vsel %vm165_vm4, 1.0, %v719_v10  ;;  %vm434_vm7 = vcmp.eq.s32.totalorder %v763_v6, %v432_v40 }
  0x1b   : > { %v590_v45 = vsel %vm433_vm5, 1.0, %v719_v10  ;;  %v446_v46 = vrot.slane %v672_v41, %v833_v33  ;;  %vm178_vm8 = vcmp.eq.s32.totalorder %v760_v4, %v177_v43  ;;  %vm179_vm9 = vcmp.eq.s32.totalorder %v763_v6, %v177_v43 }
  0x1c   : > { %v591_v47 = vsel %vm434_vm7, 1.0, %v719_v10  ;;  %vm180_vm10 = vcmp.eq.s32.totalorder %v766_v7, %v177_v43  ;;  %v577_v48 = vsel %vm178_vm8, 1.0, %v719_v10  ;;  %v578_v49 = vsel %vm179_vm9, 1.0, %v719_v10 }
  0x1d   : > { %vm447_vm11 = vcmp.eq.s32.totalorder %v760_v4, %v446_v46  ;;  %vm448_vm12 = vcmp.eq.s32.totalorder %v763_v6, %v446_v46  ;;  %v187_v50 = vadd.f32 %v577_v48, %v574_v42  ;;  %v188_v51 = vadd.f32 %v578_v49, %v575_v44 }
  0x1e   : > { %v593_v52 = vsel %vm447_vm11, 1.0, %v719_v10  ;;  %v594_v53 = vsel %vm448_vm12, 1.0, %v719_v10  ;;  %v576_v56 = vsel %vm166_vm6, 1.0, %v719_v10  ;;  %v579_v57 = vsel %vm180_vm10, 1.0, %v719_v10 }
  0x1f   : > { %v456_v54 = vadd.f32 %v593_v52, %v590_v45  ;;  %v457_v55 = vadd.f32 %v594_v53, %v591_v47  ;;  %v653_v58 = vpack.c.bf16 %v188_v51, %v187_v50  ;;  %v189_v60 = vadd.f32 %v579_v57, %v576_v56 }
  0x20   : > { %vm435_vm13 = vcmp.eq.s32.totalorder %v766_v7, %v432_v40  ;;  %vm449_vm14 = vcmp.eq.s32.totalorder %v766_v7, %v446_v46  ;;  %vm299_vm15 = vcmp.eq.s32.totalorder %v760_v4, %v298_v27  ;;  %vm300_vm0 = vcmp.eq.s32.totalorder %v763_v6, %v298_v27 }
  0x21   : > { %v659_v59 = vpack.c.bf16 %v457_v55, %v456_v54  ;;  %654 = vmatpush3.bf16.msra.mxu1 %v653_v58  ;;  %v592_v61 = vsel %vm435_vm13, 1.0, %v719_v10  ;;  %v595_v62 = vsel %vm449_vm14, 1.0, %v719_v10  ;;  %v582_v28 = vsel %vm299_vm15, 1.0, %v719_v10 }
  0x22   : > { %629 = vmatprep.subr.mxu1 %v719_v10  ;;  %v458_v63 = vadd.f32 %v595_v62, %v592_v61  ;;  %v583_v32 = vsel %vm300_vm0, 1.0, %v719_v10  ;;  %vm301_vm4 = vcmp.eq.s32.totalorder %v766_v7, %v298_v27  ;;  %vm190_vm6 = vcmask 195584  }
  0x23   : > { %660 = vmatpush3.bf16.msra.mxu0 %v659_v59  ;;  %v584_v39 = vsel %vm301_vm4, 1.0, %v719_v10  ;;  %vm143_vm7 = vcmp.lt.f32.partialorder %v793_v16, 1.0  ;;  %vm144_vm8 = vcmp.gt.f32.partialorder %v793_v16, 16.0  ;;  %vm278_vm9 = vcmp.lt.f32.partialorder %v271_v2, 1.0 }
  0x24   : > { %647 = vmatprep.subr.mxu0 %v719_v10  ;;  %vm279_vm10 = vcmp.gt.f32.partialorder %v271_v2, 16.0  ;;  %vm412_vm11 = vcmp.lt.f32.partialorder %v796_v17, 1.0  ;;  %vm145_vm12 = vmor %vm143_vm7, %vm144_vm8 }
  0x25   : > { %630 = vmatpush3.msra.mxu1 %v189_v60  ;;  %vm280_vm13 = vmor %vm278_vm9, %vm279_vm10  ;;  %v573_v48 = vsel %vm145_vm12, 1.0, %v719_v10 }
  0x26   : > { %655 = vmatprep.subr.bf16.mxu1 %v721_v13  ;;  %v876_v13 = vmin.f32 %v276_v12, 17.0  ;;  %v581_v49 = vsel %vm280_vm13, 1.0, %v719_v10  ;;  %v148_v51 = vsub.f32 1.0, %v573_v48  ;;  %v150_v55 = vmul.f32 %v573_v48, %v802_v18 }
  0x27   : > { %648 = vmatpush3.msra.mxu0 %v458_v63  ;;  %v283_v52 = vsub.f32 1.0, %v581_v49  ;;  %v285_v57 = vmul.f32 %v581_v49, %v272_v5 }
  0x28   : > { %v667_v21 = vtrunc.f32 %v876_v13  ;;  %v149_v54 = vmul.f32 %v148_v51, %v793_v16 }
  0x29   : > { %v284_v56 = vmul.f32 %v283_v52, %v271_v2 }
  0x2a   : > { %v668_v26 = vcvt.f32.s32 %v667_v21  ;;  %v151_v60 = vadd.f32 %v150_v55, %v149_v54 }
  0x2b   : > { %v286_v61 = vadd.f32 %v285_v57, %v284_v56 }
  0x2c   : > { %v312_v15 = vrot.slane %v668_v26, %v881_v23  ;;  %v152_v63 = vmax.f32 %v151_v60, 0.0 }
  0x2d   : > { %v287_v8 = vmax.f32 %v286_v61, 0.0 }
  0x2e   : > { %vm313_vm2 = vcmp.eq.s32.totalorder %v760_v4, %v312_v15  ;;  %vm314_vm3 = vcmp.eq.s32.totalorder %v763_v6, %v312_v15  ;;  %vm315_vm5 = vcmp.eq.s32.totalorder %v766_v7, %v312_v15 }
  0x2f   : > { %v585_v34 = vsel %vm313_vm2, 1.0, %v719_v10  ;;  %v586_v35 = vsel %vm314_vm3, 1.0, %v719_v10  ;;  %v587_v40 = vsel %vm315_vm5, 1.0, %v719_v10  ;;  %v288_v12 = vmin.f32 %v287_v8, 17.0 }
  0x30   : > { %v322_v36 = vadd.f32 %v585_v34, %v582_v28  ;;  %v323_v37 = vadd.f32 %v586_v35, %v583_v32  ;;  %v324_v43 = vadd.f32 %v587_v40, %v584_v39 }
  0x31   : > { %v289_v18 = vsub.f32 %v874_v14, %v288_v12  ;;  %v291_v2 = vsub.f32 %v876_v13, %v288_v12 }
  0x32   : > { %v656_v38 = vpack.c.bf16 %v323_v37, %v322_v36 }
  0x33   : > { %v290_v26 = vadd.f32 1.0, %v289_v18  ;;  %v292_v27 = vsub.f32 1.0, %v291_v2 }
  0x35   : > { %v293_v34 = vmul.f32 %v292_v27, %v290_v26 }
  0x37   : > { %v401_v13 = vrot.slane %v293_v34, %v881_v23 }
  0xde   : > { %v121_v41 = vpop.f32.mrb[0].mxu0 }
  0xdf   : > { %v618_v42 = vpop.f32.mrb[1].mxu0  ;;  %632 = vmatmul.mubr.msk.f32.vlgmr.msra.gmra.mrb[0].mxu1 %vm190_vm6, %v121_v41 }
  0xe0   : > { %657 = vmatpush3.bf16.msra.mxu1 %v656_v38  ;;  %640 = vmatprep.mubr.msk.f32.mxu1 %vm720_vm1, %v719_v10  ;;  %vm413_vm1 = vcmp.gt.f32.partialorder %v796_v17, 16.0 }
  0xe1   : > { %638 = vmatprep.subr.mxu1 %v719_v10  ;;  %vm414_vm14 = vmor %vm412_vm11, %vm413_vm1 }
  0xe2   : > { %v126_v44 = vpop.f32.mrb[2].mxu0  ;;  %v589_v50 = vsel %vm414_vm14, 1.0, %v719_v10  ;;  %v153_v10 = vmin.f32 %v152_v63, 17.0 }
  0xe3   : > { %v621_v45 = vpop.f32.mrb[3].mxu0  ;;  %v417_v53 = vsub.f32 1.0, %v589_v50  ;;  %v419_v59 = vmul.f32 %v589_v50, %v807_v19 }
  0xe4   : > { %639 = vmatpush3.msra.mxu1 %v324_v43  ;;  %v154_v21 = vsub.f32 %v817_v24, %v153_v10  ;;  %v156_v16 = vsub.f32 %v829_v31, %v153_v10 }
  0xe5   : > { %641 = vmatmul.mubr.msk.f32.vlgmr.msra.gmra.mrb[2].mxu1 %vm190_vm6, %v126_v44  ;;  %v418_v58 = vmul.f32 %v417_v53, %v796_v17 }
  0xe6   : > { %v131_v46 = vpop.f32.mrb[4].mxu0  ;;  %v155_v5 = vadd.f32 1.0, %v154_v21  ;;  %v157_v22 = vsub.f32 1.0, %v156_v16 }
  0xe7   : > { %v624_v47 = vpop.f32.mrb[5].mxu0  ;;  %650 = vmatmul.mubr.msk.f32.vlgmr.msra.gmra.mrb[6].mxu0 %vm190_vm6, %v131_v46  ;;  %v420_v62 = vadd.f32 %v419_v59, %v418_v58 }
  0xe8   : > { %v158_v32 = vmul.f32 %v157_v22, %v155_v5 }
  0xe9   : > { %v421_v11 = vmax.f32 %v420_v62, 0.0 }
  0xea   : > { %v267_v14 = vrot.slane %v158_v32, %v823_v29 }
  0xeb   : > { %v422_v20 = vmin.f32 %v421_v11, 17.0 }
  0xed   : > { %v423_v17 = vsub.f32 %v819_v25, %v422_v20  ;;  %v425_v19 = vsub.f32 %v825_v30, %v422_v20 }
  0xef   : > { %v424_v15 = vadd.f32 1.0, %v423_v17  ;;  %v426_v28 = vsub.f32 1.0, %v425_v19 }
  0xf1   : > { %v427_v31 = vmul.f32 %v426_v28, %v424_v15 }
  0xf3   : > { %v535_v25 = vrot.slane %v427_v31, %v833_v33 }
 0x1b2   : > { %v260_v24 = vpop.f32.mrb[0].mxu1 }
 0x1b3   : > { %v633_v35 = vpop.f32.mrb[1].mxu1  ;;  %v268_v30 = vmul.f32 %v267_v14, %v260_v24 }
 0x1b8   : > { %v394_v36 = vpop.f32.mrb[2].mxu1 }
 0x1b9   : > { %v402_v37 = vmul.f32 %v401_v13, %v394_v36  ;;  %v642_v38 = vpop.f32.mrb[3].mxu1  ;;  %34 = sbr.rel (!%p32_p0) target bundleno = 7 (0x7), region = 42 }
 0x1ba   : > { %v528_v39 = vpop.f32.mrb[6].mxu0 }
 0x1bb   : > { %v403_v40 = vadd.f32 %v402_v37, %v268_v30  ;;  %v536_v41 = vmul.f32 %v535_v25, %v528_v39  ;;  %v651_v42 = vpop.f32.mrb[7].mxu0 }
 0x1bd   : > { %v537_v43 = vadd.f32 %v536_v41, %v403_v40 }
 0x1bf   : > { %540 = vst [vmem:[%s539_s26] sm:$0xff] %v537_v43 }
 0x1c0   :  { %698 = shalt.err (!%p695_p5)
}
 0x1c1   :  { %s699_s5 = scalar_lea.hbm %s942_s3, 256 }
 0x1c2   :  { %p700_p6 = scmp.ne.s32.totalorder %s942_s3, %s699_s5  ;;  %p703_p7 = scmp.lt.u32.totalorder %s699_s5, %s942_s3 }
 0x1c4   :  { %p705_p8 = pnand %p703_p7, %p700_p6 }
 0x1c6   :  { %708 = shalt.err (!%p705_p8)
}
 0x1c7   :  { %s723_s0 = smov 128   ;;  %s724_s1 = smov 8  }
 0x1c8   :  { %552 = dma.vmem_to_hbm [thread:$0]  %s547_s28, 256, %s942_s3, [#allocation3], %s723_s0, %s723_s0, %s724_s1  }
 0x1c9   :  { %713 = dma.done.wait [#allocation3], 256  }
 0x1ca   :  { %714 = vsyncadd [#allocation3], 4294967040 }
 0x1cb   :  { %556 = vsyncpa [#allocation3], 1 }

</bundles_post_ra>
